<compile_context>
chip_gen: v7x
topology: tpu7x:2x2x1
jax: 0.10.0
libtpu: 0.0.40
codegen_flags: <defaults>
</compile_context>

<pallas_src>
import jax
import jax.numpy as jnp
from jax.experimental import pallas as pl
from jax.experimental.pallas import tpu as pltpu

LANE = 128      # TPU lane width: output channels are padded to a multiple of this
SUBLANE = 8     # f32 sublane granularity
TM_MAX = 512    # rows of the flattened (N*H*W) axis per grid step (f32 tiles)


def _round_up(v, m):
    return ((v + m - 1) // m) * m


# ----------------------------------------------------------------------------
# Pallas kernel: one M-tile of  y = silu(x @ w)   (f32 accumulation on the MXU)
# ----------------------------------------------------------------------------
def _matmul_silu_kernel(x_ref, w_ref, o_ref):
    # x_ref: (TM, K)   w_ref: (K, Np)   o_ref: (TM, Np)
    acc = jnp.dot(x_ref[...], w_ref[...], preferred_element_type=jnp.float32)
    sig = 1.0 / (1.0 + jnp.exp(-acc))          # sigmoid via EUP exp + reciprocal
    o_ref[...] = (acc * sig).astype(o_ref.dtype)


# ----------------------------------------------------------------------------
# Fused 3x3 'same' convolution (stride 1, dilation 1, no bias) + SiLU
# ----------------------------------------------------------------------------
def conv3x3_silu(x_nchw, w_flat, out_channels):
    """
    x_nchw : (N, Cin, H, W)   activations, PyTorch NCHW layout
    w_flat : (9*Cin, Np)      weights, rows ordered (kh, kw, Cin)-major,
                              output channels zero-padded to Np = k*128
    returns: (N, out_channels, H, W)
    """
    N, Cin, H, W = x_nchw.shape
    K, Np = w_flat.shape
    assert K == 9 * Cin and Np % LANE == 0 and out_channels <= Np

    # NHWC + zero 'same' padding; im2col via 9 static shifted slices.
    x = jnp.transpose(x_nchw, (0, 2, 3, 1))
    xp = jnp.pad(x, ((0, 0), (1, 1), (1, 1), (0, 0)))
    cols = jnp.concatenate(
        [xp[:, dy:dy + H, dx:dx + W, :] for dy in range(3) for dx in range(3)],
        axis=-1,
    ).reshape(N * H * W, K)

    # Tile the flattened row axis; pad so every grid step sees a full tile.
    M = N * H * W
    tm = TM_MAX if M > TM_MAX else _round_up(M, SUBLANE)
    Mp = _round_up(M, tm)
    if Mp != M:
        cols = jnp.pad(cols, ((0, Mp - M), (0, 0)))

    grid = (Mp // tm,)
    flops = 2 * Mp * K * Np
    bytes_accessed = 4 * (Mp * K + K * Np + Mp * Np)

    y = pl.pallas_call(
        _matmul_silu_kernel,
        out_shape=jax.ShapeDtypeStruct((Mp, Np), x_nchw.dtype),
        grid=grid,
        in_specs=[
            pl.BlockSpec((tm, K), lambda i: (i, 0)),   # activations: streamed
            pl.BlockSpec((K, Np), lambda i: (0, 0)),   # weights: VMEM-resident
        ],
        out_specs=pl.BlockSpec((tm, Np), lambda i: (i, 0)),
        compiler_params=pltpu.CompilerParams(
            dimension_semantics=("parallel",),          # v7x: shard M tiles over 2 TCs
        ),
        cost_estimate=pl.CostEstimate(
            flops=flops, transcendentals=Mp * Np, bytes_accessed=bytes_accessed),
    )(cols, w_flat)

    y = y[:M, :out_channels].reshape(N, H, W, out_channels)
    return jnp.transpose(y, (0, 3, 1, 2))


# ----------------------------------------------------------------------------
# Modules
# ----------------------------------------------------------------------------
class Conv2dResBlock:
    """JAX/Pallas port of Conv2dResBlock with EdgeEncoder's default arguments:
    kernel_size=3, padding=1, stride=1, dilation=1, bias=False,
    residual=False, basic_block=False, activation='silu'.
    Forward: y = SiLU(Conv2d_3x3(x)).
    """
    # TODO(synk): training-mode Dropout(p=0.1) and the residual/basic_block
    # variants are not used by EdgeEncoder and are not implemented (eval no-op).

    def __init__(self, in_dim, out_dim, key):
        fan_in = in_dim * 9
        bound = 1.0 / (fan_in ** 0.5)      # ~ PyTorch kaiming_uniform(a=sqrt(5))
        self.weight = jax.random.uniform(
            key, (out_dim, in_dim, 3, 3), jnp.float32, -bound, bound)  # OIHW
        self.in_dim = in_dim
        self.out_dim = out_dim
        # Pre-flatten once: (O, I, kh, kw) -> (kh, kw, I, O) -> (9*I, O), then
        # zero-pad the output-channel (lane) axis to a multiple of 128.
        w = jnp.transpose(self.weight, (2, 3, 1, 0)).reshape(9 * in_dim, out_dim)
        n_pad = _round_up(out_dim, LANE)
        self.w_flat = jnp.pad(w, ((0, 0), (0, n_pad - out_dim)))

    def __call__(self, x):
        return conv3x3_silu(x, self.w_flat, self.out_dim)


class EdgeEncoder:
    """JAX/Pallas port of EdgeEncoder.forward."""

    def __init__(self, out_dim, edge_feats, raw_laplacian=None, key=None):
        assert out_dim > edge_feats
        if key is None:
            key = jax.random.PRNGKey(0)
        self.return_lap = raw_laplacian
        if self.return_lap:
            out_dim = out_dim - edge_feats
        conv_dim0 = int(out_dim / 3 * 2)
        conv_dim1 = int(out_dim - conv_dim0)
        k1, k2 = jax.random.split(key)
        self.lap_conv1 = Conv2dResBlock(edge_feats, conv_dim0, key=k1)
        self.lap_conv2 = Conv2dResBlock(conv_dim0, conv_dim1, key=k2)

    def __call__(self, lap):
        edge1 = self.lap_conv1(lap)
        edge2 = self.lap_conv2(edge1)
        if self.return_lap:
            return jnp.concatenate([lap, edge1, edge2], axis=1)
        return jnp.concatenate([edge1, edge2], axis=1)


# ----------------------------------------------------------------------------
# Demo / smoke test
# ----------------------------------------------------------------------------
if __name__ == "__main__":
    key = jax.random.PRNGKey(0)
    kx, kmod = jax.random.split(key)

    batch, edge_feats, spatial, out_dim = 2, 3, 16, 32
    lap = jax.random.normal(kx, (batch, edge_feats, spatial, spatial), jnp.float32)

    enc = EdgeEncoder(out_dim=out_dim, edge_feats=edge_feats, key=kmod)
    y = jax.block_until_ready(enc(lap))

    conv_dim0 = int(out_dim / 3 * 2)
    conv_dim1 = out_dim - conv_dim0
    assert y.shape == (batch, conv_dim0 + conv_dim1, spatial, spatial), y.shape

    # Pure-JAX reference (XLA conv at HIGHEST precision) for correctness.
    def ref_block(x, w_oihw):
        z = jax.lax.conv_general_dilated(
            x, w_oihw, window_strides=(1, 1), padding=((1, 1), (1, 1)),
            dimension_numbers=("NCHW", "OIHW", "NCHW"),
            precision=jax.lax.Precision.HIGHEST)
        return z * jax.nn.sigmoid(z)

    e1 = ref_block(lap, enc.lap_conv1.weight)
    e2 = ref_block(e1, enc.lap_conv2.weight)
    y_ref = jnp.concatenate([e1, e2], axis=1)

    max_err = float(jnp.max(jnp.abs(y - y_ref)))
    assert jnp.allclose(y, y_ref, atol=1e-3, rtol=1e-3), f"max_err={max_err}"

    print("KERNEL_OK")
</pallas_src>

<mosaic_0001>
module attributes {stable_mosaic.version = 11 : i64} {
  func.func @_matmul_silu_kernel(%arg0: i32, %arg1: memref<512x27xf32, #tpu.memory_space<vmem>>, %arg2: memref<27x128xf32, #tpu.memory_space<vmem>>, %arg3: memref<512x128xf32, #tpu.memory_space<vmem>>) attributes {dimension_semantics = [#tpu.dimension_semantics<parallel>], iteration_bounds = array<i64: 1>, scalar_prefetch = 0 : i64, scratch_operands = 0 : i64, tpu.core_type = #tpu.core_type<tc>, window_params = [{transform_indices = @transform_0, window_bounds = array<i64: 512, 27>}, {pipeline_mode = #tpu.pipeline_mode<synchronous>, transform_indices = @transform_1, window_bounds = array<i64: 27, 128>}, {transform_indices = @transform_2, window_bounds = array<i64: 512, 128>}]} {
    %c0 = arith.constant 0 : index
    %c0_0 = arith.constant 0 : index
    %0 = vector.load %arg1[%c0, %c0_0] : memref<512x27xf32, #tpu.memory_space<vmem>>, vector<512x27xf32>
    %c0_1 = arith.constant 0 : index
    %c0_2 = arith.constant 0 : index
    %1 = vector.load %arg2[%c0_1, %c0_2] : memref<27x128xf32, #tpu.memory_space<vmem>>, vector<27x128xf32>
    %cst = arith.constant dense<0.000000e+00> : vector<512x128xf32>
    %2 = tpu.matmul %0, %1, %cst {dimension_numbers = #tpu.dot_dimension_numbers<[1], [0], [0], [1], [0, 0, 1, 1], [], []>} : vector<512x27xf32>, vector<27x128xf32>, vector<512x128xf32> -> vector<512x128xf32>
    %cst_3 = arith.constant 0.000000e+00 : f32
    %3 = vector.broadcast %cst_3 : f32 to vector<512x128xf32>
    %4 = arith.subf %3, %2 : vector<512x128xf32>
    %5 = math.exp %4 : vector<512x128xf32>
    %cst_4 = arith.constant 1.000000e+00 : f32
    %6 = vector.broadcast %cst_4 : f32 to vector<512x128xf32>
    %7 = arith.addf %6, %5 : vector<512x128xf32>
    %cst_5 = arith.constant 1.000000e+00 : f32
    %8 = vector.broadcast %cst_5 : f32 to vector<512x128xf32>
    %9 = arith.divf %8, %7 : vector<512x128xf32>
    %10 = arith.mulf %2, %9 : vector<512x128xf32>
    %c0_6 = arith.constant 0 : index
    %c0_7 = arith.constant 0 : index
    %11 = vector.load %arg3[%c0_6, %c0_7] : memref<512x128xf32, #tpu.memory_space<vmem>>, vector<512x128xf32>
    tpu.vector_store %arg3[%c0_6, %c0_7], %10 {strides = array<i32>} : memref<512x128xf32, #tpu.memory_space<vmem>>, vector<512x128xf32>,
    return
  }
  func.func @transform_0(%arg0: i32) -> (i32, i32) {
    %c0_i32 = arith.constant 0 : i32
    %c0_i32_0 = arith.constant 0 : i32
    return %arg0, %c0_i32 : i32, i32
  }
  func.func @transform_1(%arg0: i32) -> (i32, i32) {
    %c0_i32 = arith.constant 0 : i32
    %c0_i32_0 = arith.constant 0 : i32
    %c0_i32_1 = arith.constant 0 : i32
    return %c0_i32, %c0_i32_0 : i32, i32
  }
  func.func @transform_2(%arg0: i32) -> (i32, i32) {
    %c0_i32 = arith.constant 0 : i32
    %c0_i32_0 = arith.constant 0 : i32
    return %arg0, %c0_i32 : i32, i32
  }
}

</mosaic_0001>

<bundles_post_ra>
// kernel: tpu_custom_call.1
= control target key start
LH: loop header
LB: loop body
LE: loop exit
PB: predicated region body
PF: predicated region fallthrough
CT: control target
= control target key end

     0   :  { %vm273_vm0 = vcmask 1042432   ;;  %vm80_vm1 = vcmask 220160   ;;  %vm1725_vm2 = vmmov 1   ;;  %s2280_s0 = inlined_call_operand.vmem [shape: f32[512,27], index: 0, kind: input, shape index: {}]   ;;  %s2281_s1 = inlined_call_operand.vmem [shape: f32[27,128], index: 1, kind: input, shape index: {}]   ;;  %s2282_s2 = inlined_call_operand.hbm [shape: f32[512,128], index: 2, kind: output, shape index: {}]  }
   0x1   :  { %v76_v0 = vld [vmem:[%s2281_s1] sm:$0xff]  ;;  %v77_v1 = vld [vmem:[%s2281_s1 + $0x8] sm:$0xff]  ;;  %v78_v2 = vld [vmem:[%s2281_s1 + $0x10] sm:$0xff] }
   0x2   :  { %v1427_v3 = vpack.c.bf16 %v77_v1, %v76_v0  ;;  %v79_v4 = vld [vmem:[%s2281_s1 + $0x18] sm:$0x7]  ;;  %v12_v5 = vld [vmem:[%s2280_s0] sm:$0xff]  ;;  %vm1432_vm3 = vmpackc.low %vm273_vm0, %vm1725_vm2 }
   0x3   :  { %v1431_v6 = vpack.c.bf16 %v79_v4, %v78_v2  ;;  %1331 = vmatprep.mubr.msk.f32.mxu0 %vm80_vm1, %v12_v5  ;;  %v44_v7 = vld [vmem:[%s2280_s0 + $0x100] sm:$0xff]  ;;  %v13_v8 = vld [vmem:[%s2280_s0 + $0x8] sm:$0xff]  ;;  %v14_v10 = vld [vmem:[%s2280_s0 + $0x10] sm:$0xff] }
   0x4   :  { %1428 = vmatprep.subr.bf16.mxu0 %v1427_v3  ;;  %1437 = vmatprep.subr.bf16.mxu1 %v1427_v3  ;;  %v45_v9 = vld [vmem:[%s2280_s0 + $0x108] sm:$0xff]  ;;  %v46_v11 = vld [vmem:[%s2280_s0 + $0x110] sm:$0xff]  ;;  %v15_v12 = vld [vmem:[%s2280_s0 + $0x18] sm:$0xff] }
   0x5   :  { %1430 = vmatpush3.bf16.msra.mxu0 %v1427_v3  ;;  %1439 = vmatpush3.bf16.msra.mxu1 %v1427_v3  ;;  %v47_v13 = vld [vmem:[%s2280_s0 + $0x118] sm:$0xff]  ;;  %v16_v14 = vld [vmem:[%s2280_s0 + $0x20] sm:$0xff]  ;;  %v17_v16 = vld [vmem:[%s2280_s0 + $0x28] sm:$0xff] }
   0x6   :  { %1433 = vmatprep.subr.msk.bf16.mxu0 %vm1432_vm3, %v1431_v6  ;;  %1438 = vmatprep.subr.msk.bf16.mxu1 %vm1432_vm3, %v1431_v6  ;;  %v48_v15 = vld [vmem:[%s2280_s0 + $0x120] sm:$0xff]  ;;  %v49_v17 = vld [vmem:[%s2280_s0 + $0x128] sm:$0xff]  ;;  %v18_v18 = vld [vmem:[%s2280_s0 + $0x30] sm:$0xff] }
   0x7   :  { %1379 = vmatprep.mubr.msk.f32.mxu1 %vm80_vm1, %v44_v7  ;;  %v50_v19 = vld [vmem:[%s2280_s0 + $0x130] sm:$0xff]  ;;  %v19_v20 = vld [vmem:[%s2280_s0 + $0x38] sm:$0xff]  ;;  %v20_v22 = vld [vmem:[%s2280_s0 + $0x40] sm:$0xff] }
   0x8   :  { %v51_v21 = vld [vmem:[%s2280_s0 + $0x138] sm:$0xff]  ;;  %v52_v23 = vld [vmem:[%s2280_s0 + $0x140] sm:$0xff] }
   0x9   :  { %1436 = vmatpush3.bf16.msk.msra.mxu0 %vm1432_vm3, %v1431_v6  ;;  %1440 = vmatpush3.bf16.msk.msra.mxu1 %vm1432_vm3, %v1431_v6 }
   0xc   :  { %1332 = vmatmul.mubr.msk.f32.vlgmr.msra.gmra.mrb[0].mxu0 %vm80_vm1, %v13_v8  ;;  %1380 = vmatmul.mubr.msk.f32.vlgmr.msra.gmra.mrb[0].mxu1 %vm80_vm1, %v45_v9 }
   0xd   :  { %1334 = vmatprep.mubr.msk.f32.mxu0 %vm80_vm1, %v14_v10  ;;  %1382 = vmatprep.mubr.msk.f32.mxu1 %vm80_vm1, %v46_v11 }
  0x10   :  { %1335 = vmatmul.mubr.msk.f32.gmra.mrb[2].mxu0 %vm80_vm1, %v15_v12  ;;  %1383 = vmatmul.mubr.msk.f32.gmra.mrb[2].mxu1 %vm80_vm1, %v47_v13 }
  0x11   :  { %1337 = vmatprep.mubr.msk.f32.mxu0 %vm80_vm1, %v16_v14  ;;  %1385 = vmatprep.mubr.msk.f32.mxu1 %vm80_vm1, %v48_v15 }
  0x14   :  { %1338 = vmatmul.mubr.msk.f32.gmra.mrb[4].mxu0 %vm80_vm1, %v17_v16  ;;  %1386 = vmatmul.mubr.msk.f32.gmra.mrb[4].mxu1 %vm80_vm1, %v49_v17 }
  0x15   :  { %1340 = vmatprep.mubr.msk.f32.mxu0 %vm80_vm1, %v18_v18  ;;  %1388 = vmatprep.mubr.msk.f32.mxu1 %vm80_vm1, %v50_v19 }
  0x18   :  { %1341 = vmatmul.mubr.msk.f32.gmra.mrb[6].mxu0 %vm80_vm1, %v19_v20  ;;  %1389 = vmatmul.mubr.msk.f32.gmra.mrb[6].mxu1 %vm80_vm1, %v51_v21 }
  0x19   :  { %7 = vsyncpa [#allocation3], 0  ;;  %1343 = vmatprep.mubr.msk.f32.mxu0 %vm80_vm1, %v20_v22  ;;  %1391 = vmatprep.mubr.msk.f32.mxu1 %vm80_vm1, %v52_v23  ;;  %v21_v24 = vld [vmem:[%s2280_s0 + $0x48] sm:$0xff]  ;;  %v22_v26 = vld [vmem:[%s2280_s0 + $0x50] sm:$0xff] }
  0x1a   :  { %v53_v25 = vld [vmem:[%s2280_s0 + $0x148] sm:$0xff]  ;;  %v54_v27 = vld [vmem:[%s2280_s0 + $0x150] sm:$0xff]  ;;  %v23_v28 = vld [vmem:[%s2280_s0 + $0x58] sm:$0xff] }
  0x1b   :  { %v55_v29 = vld [vmem:[%s2280_s0 + $0x158] sm:$0xff]  ;;  %v24_v30 = vld [vmem:[%s2280_s0 + $0x60] sm:$0xff]  ;;  %v25_v32 = vld [vmem:[%s2280_s0 + $0x68] sm:$0xff] }
  0x1c   :  { %1344 = vmatmul.mubr.msk.f32.gmra.mrb[8].mxu0 %vm80_vm1, %v21_v24  ;;  %1392 = vmatmul.mubr.msk.f32.gmra.mrb[8].mxu1 %vm80_vm1, %v53_v25  ;;  %v56_v31 = vld [vmem:[%s2280_s0 + $0x160] sm:$0xff]  ;;  %v57_v33 = vld [vmem:[%s2280_s0 + $0x168] sm:$0xff]  ;;  %v26_v34 = vld [vmem:[%s2280_s0 + $0x70] sm:$0xff] }
  0x1d   :  { %1346 = vmatprep.mubr.msk.f32.mxu0 %vm80_vm1, %v22_v26  ;;  %1394 = vmatprep.mubr.msk.f32.mxu1 %vm80_vm1, %v54_v27  ;;  %v58_v35 = vld [vmem:[%s2280_s0 + $0x170] sm:$0xff]  ;;  %v27_v36 = vld [vmem:[%s2280_s0 + $0x78] sm:$0xff]  ;;  %v28_v38 = vld [vmem:[%s2280_s0 + $0x80] sm:$0xff] }
  0x1e   :  { %v59_v37 = vld [vmem:[%s2280_s0 + $0x178] sm:$0xff]  ;;  %v60_v39 = vld [vmem:[%s2280_s0 + $0x180] sm:$0xff]  ;;  %v29_v40 = vld [vmem:[%s2280_s0 + $0x88] sm:$0xff] }
  0x1f   :  { %v61_v41 = vld [vmem:[%s2280_s0 + $0x188] sm:$0xff]  ;;  %v30_v42 = vld [vmem:[%s2280_s0 + $0x90] sm:$0xff]  ;;  %v31_v44 = vld [vmem:[%s2280_s0 + $0x98] sm:$0xff] }
  0x20   :  { %1347 = vmatmul.mubr.msk.f32.gmra.mrb[10].mxu0 %vm80_vm1, %v23_v28  ;;  %1395 = vmatmul.mubr.msk.f32.gmra.mrb[10].mxu1 %vm80_vm1, %v55_v29  ;;  %v62_v43 = vld [vmem:[%s2280_s0 + $0x190] sm:$0xff]  ;;  %v63_v45 = vld [vmem:[%s2280_s0 + $0x198] sm:$0xff]  ;;  %v32_v46 = vld [vmem:[%s2280_s0 + $0xa0] sm:$0xff] }
  0x21   :  { %1349 = vmatprep.mubr.msk.f32.mxu0 %vm80_vm1, %v24_v30  ;;  %1397 = vmatprep.mubr.msk.f32.mxu1 %vm80_vm1, %v56_v31  ;;  %v64_v47 = vld [vmem:[%s2280_s0 + $0x1a0] sm:$0xff]  ;;  %v33_v48 = vld [vmem:[%s2280_s0 + $0xa8] sm:$0xff]  ;;  %v34_v50 = vld [vmem:[%s2280_s0 + $0xb0] sm:$0xff] }
  0x22   :  { %v65_v49 = vld [vmem:[%s2280_s0 + $0x1a8] sm:$0xff]  ;;  %v66_v51 = vld [vmem:[%s2280_s0 + $0x1b0] sm:$0xff]  ;;  %v35_v52 = vld [vmem:[%s2280_s0 + $0xb8] sm:$0xff] }
  0x23   :  { %v67_v53 = vld [vmem:[%s2280_s0 + $0x1b8] sm:$0xff]  ;;  %v36_v54 = vld [vmem:[%s2280_s0 + $0xc0] sm:$0xff]  ;;  %v37_v56 = vld [vmem:[%s2280_s0 + $0xc8] sm:$0xff] }
  0x24   :  { %1350 = vmatmul.mubr.msk.f32.gmra.mrb[12].mxu0 %vm80_vm1, %v25_v32  ;;  %1398 = vmatmul.mubr.msk.f32.gmra.mrb[12].mxu1 %vm80_vm1, %v57_v33  ;;  %v68_v55 = vld [vmem:[%s2280_s0 + $0x1c0] sm:$0xff]  ;;  %v69_v57 = vld [vmem:[%s2280_s0 + $0x1c8] sm:$0xff]  ;;  %v38_v58 = vld [vmem:[%s2280_s0 + $0xd0] sm:$0xff] }
  0x25   :  { %1352 = vmatprep.mubr.msk.f32.mxu0 %vm80_vm1, %v26_v34  ;;  %1400 = vmatprep.mubr.msk.f32.mxu1 %vm80_vm1, %v58_v35  ;;  %v70_v59 = vld [vmem:[%s2280_s0 + $0x1d0] sm:$0xff]  ;;  %v39_v60 = vld [vmem:[%s2280_s0 + $0xd8] sm:$0xff]  ;;  %v40_v62 = vld [vmem:[%s2280_s0 + $0xe0] sm:$0xff] }
  0x26   :  { %v71_v61 = vld [vmem:[%s2280_s0 + $0x1d8] sm:$0xff]  ;;  %v72_v63 = vld [vmem:[%s2280_s0 + $0x1e0] sm:$0xff]  ;;  %v41_v0 = vld [vmem:[%s2280_s0 + $0xe8] sm:$0xff] }
  0x27   :  { %v73_v1 = vld [vmem:[%s2280_s0 + $0x1e8] sm:$0xff]  ;;  %v42_v2 = vld [vmem:[%s2280_s0 + $0xf0] sm:$0xff]  ;;  %v43_v4 = vld [vmem:[%s2280_s0 + $0xf8] sm:$0xff] }
  0x28   :  { %1353 = vmatmul.mubr.msk.f32.gmra.mrb[14].mxu0 %vm80_vm1, %v27_v36  ;;  %1401 = vmatmul.mubr.msk.f32.gmra.mrb[14].mxu1 %vm80_vm1, %v59_v37  ;;  %v74_v3 = vld [vmem:[%s2280_s0 + $0x1f0] sm:$0xff]  ;;  %v75_v5 = vld [vmem:[%s2280_s0 + $0x1f8] sm:$0xff]  ;;  %s1726_s0 = smov [#allocation2]  }
  0x29   :  { %1355 = vmatprep.mubr.msk.f32.mxu0 %vm80_vm1, %v28_v38  ;;  %1403 = vmatprep.mubr.msk.f32.mxu1 %vm80_vm1, %v60_v39  ;;  %s1179_s28 = sshll.u32 %s1726_s0, 4  ;;  %s1180_s28 = int_to_ptr.vmem [resolvable:$true] %s1179_s28 }
  0x2a   :  { %s1701_s29 = scalar_lea.vmem %s1180_s28, 8192  ;;  %p1706_p1 = scmp.lt.s32.totalorder %s1180_s28, %s1180_s28 }
  0x2b   :  { %p1702_p0 = scmp.ne.s32.totalorder %s1180_s28, %s1701_s29  ;;  %p1707_p2 = scmp.lt.s32.totalorder %s1701_s29, %s1701_s29 }
  0x2c   :  { %1356 = vmatmul.mubr.msk.f32.gmra.mrb[16].mxu0 %vm80_vm1, %v29_v40  ;;  %1404 = vmatmul.mubr.msk.f32.gmra.mrb[16].mxu1 %vm80_vm1, %v61_v41 }
  0x2d   :  { %1358 = vmatprep.mubr.msk.f32.mxu0 %vm80_vm1, %v30_v42  ;;  %1406 = vmatprep.mubr.msk.f32.mxu1 %vm80_vm1, %v62_v43  ;;  %p1708_p3 = por %p1707_p2, %p1706_p1 }
  0x2f   :  { %p1709_p4 = pnand %p1708_p3, %p1702_p0 }
  0x30   :  { %1359 = vmatmul.mubr.msk.f32.gmra.mrb[18].mxu0 %vm80_vm1, %v31_v44  ;;  %1407 = vmatmul.mubr.msk.f32.gmra.mrb[18].mxu1 %vm80_vm1, %v63_v45 }
  0x31   :  { %1361 = vmatprep.mubr.msk.f32.mxu0 %vm80_vm1, %v32_v46  ;;  %1409 = vmatprep.mubr.msk.f32.mxu1 %vm80_vm1, %v64_v47 }
  0x34   :  { %1362 = vmatmul.mubr.msk.f32.gmra.mrb[20].mxu0 %vm80_vm1, %v33_v48  ;;  %1410 = vmatmul.mubr.msk.f32.gmra.mrb[20].mxu1 %vm80_vm1, %v65_v49 }
  0x35   :  { %1364 = vmatprep.mubr.msk.f32.mxu0 %vm80_vm1, %v34_v50  ;;  %1412 = vmatprep.mubr.msk.f32.mxu1 %vm80_vm1, %v66_v51 }
  0x38   :  { %1365 = vmatmul.mubr.msk.f32.gmra.mrb[22].mxu0 %vm80_vm1, %v35_v52  ;;  %1413 = vmatmul.mubr.msk.f32.gmra.mrb[22].mxu1 %vm80_vm1, %v67_v53 }
  0x39   :  { %1367 = vmatprep.mubr.msk.f32.mxu0 %vm80_vm1, %v36_v54  ;;  %1415 = vmatprep.mubr.msk.f32.mxu1 %vm80_vm1, %v68_v55 }
  0x3c   :  { %1368 = vmatmul.mubr.msk.f32.gmra.mrb[24].mxu0 %vm80_vm1, %v37_v56  ;;  %1416 = vmatmul.mubr.msk.f32.gmra.mrb[24].mxu1 %vm80_vm1, %v69_v57 }
  0x3d   :  { %1370 = vmatprep.mubr.msk.f32.mxu0 %vm80_vm1, %v38_v58  ;;  %1418 = vmatprep.mubr.msk.f32.mxu1 %vm80_vm1, %v70_v59 }
  0x40   :  { %1371 = vmatmul.mubr.msk.f32.gmra.mrb[26].mxu0 %vm80_vm1, %v39_v60  ;;  %1419 = vmatmul.mubr.msk.f32.gmra.mrb[26].mxu1 %vm80_vm1, %v71_v61 }
  0x41   :  { %1373 = vmatprep.mubr.msk.f32.mxu0 %vm80_vm1, %v40_v62  ;;  %1421 = vmatprep.mubr.msk.f32.mxu1 %vm80_vm1, %v72_v63 }
  0x44   :  { %1374 = vmatmul.mubr.msk.f32.gmra.mrb[28].mxu0 %vm80_vm1, %v41_v0  ;;  %1422 = vmatmul.mubr.msk.f32.gmra.mrb[28].mxu1 %vm80_vm1, %v73_v1 }
  0x45   :  { %1376 = vmatprep.mubr.msk.f32.mxu0 %vm80_vm1, %v42_v2  ;;  %1424 = vmatprep.mubr.msk.f32.mxu1 %vm80_vm1, %v74_v3 }
  0x48   :  { %1377 = vmatmul.mubr.msk.f32.gmra.mrb[30].mxu0 %vm80_vm1, %v43_v4  ;;  %1425 = vmatmul.mubr.msk.f32.gmra.mrb[30].mxu1 %vm80_vm1, %v75_v5 }
  0xdf   :  { %v2012_v6 = vpop.f32.mrb[0].mxu0  ;;  %v2014_v7 = vpop.f32.mrb[0].mxu1 }
  0xe0   :  { %v663_v8 = vsub.f32 0.0, %v2012_v6  ;;  %v695_v9 = vsub.f32 0.0, %v2014_v7  ;;  %v2018_v10 = vpop.f32.mrb[1].mxu0  ;;  %v2020_v11 = vpop.f32.mrb[1].mxu1 }
  0xe1   :  { %v662_v12 = vsub.f32 0.0, %v2018_v10  ;;  %v694_v13 = vsub.f32 0.0, %v2020_v11 }
  0xe2   :  { %v728_v14 = vmul.f32 1.442695, %v663_v8  ;;  %v792_v15 = vmul.f32 1.442695, %v695_v9 }
  0xe3   :  { %v726_v16 = vmul.f32 1.442695, %v662_v12  ;;  %v790_v17 = vmul.f32 1.442695, %v694_v13  ;;  %v2024_v18 = vpop.f32.mrb[2].mxu0  ;;  %v2026_v19 = vpop.f32.mrb[2].mxu1 }
  0xe4   :  { %1445 = vpow2.f32 %v728_v14  ;;  %v665_v20 = vsub.f32 0.0, %v2024_v18  ;;  %v697_v21 = vsub.f32 0.0, %v2026_v19  ;;  %v2030_v22 = vpop.f32.mrb[3].mxu0  ;;  %v2032_v23 = vpop.f32.mrb[3].mxu1 }
  0xe5   :  { %1447 = vpow2.f32 %v792_v15  ;;  %v664_v24 = vsub.f32 0.0, %v2030_v22  ;;  %v696_v25 = vsub.f32 0.0, %v2032_v23 }
  0xe6   :  { %1449 = vpow2.f32 %v726_v16  ;;  %v732_v26 = vmul.f32 1.442695, %v665_v20  ;;  %v796_v27 = vmul.f32 1.442695, %v697_v21 }
  0xe7   :  { %1451 = vpow2.f32 %v790_v17  ;;  %v730_v28 = vmul.f32 1.442695, %v664_v24  ;;  %v794_v29 = vmul.f32 1.442695, %v696_v25  ;;  %v2036_v30 = vpop.f32.mrb[4].mxu0  ;;  %v2038_v31 = vpop.f32.mrb[4].mxu1 }
  0xe8   :  { %1453 = vpow2.f32 %v732_v26  ;;  %v667_v32 = vsub.f32 0.0, %v2036_v30  ;;  %v699_v33 = vsub.f32 0.0, %v2038_v31  ;;  %v2042_v34 = vpop.f32.mrb[5].mxu0  ;;  %v2044_v35 = vpop.f32.mrb[5].mxu1 }
  0xe9   :  { %1455 = vpow2.f32 %v796_v27  ;;  %v666_v36 = vsub.f32 0.0, %v2042_v34  ;;  %v698_v37 = vsub.f32 0.0, %v2044_v35 }
  0xea   :  { %1457 = vpow2.f32 %v730_v28  ;;  %v736_v38 = vmul.f32 1.442695, %v667_v32  ;;  %v800_v39 = vmul.f32 1.442695, %v699_v33 }
  0xeb   :  { %1459 = vpow2.f32 %v794_v29  ;;  %v734_v40 = vmul.f32 1.442695, %v666_v36  ;;  %v798_v41 = vmul.f32 1.442695, %v698_v37  ;;  %v2048_v42 = vpop.f32.mrb[6].mxu0  ;;  %v2050_v43 = vpop.f32.mrb[6].mxu1 }
  0xec   :  { %1461 = vpow2.f32 %v736_v38  ;;  %v669_v44 = vsub.f32 0.0, %v2048_v42  ;;  %v2053_v45 = vpop.f32.mrb[7].mxu0  ;;  %v2055_v46 = vpop.f32.mrb[7].mxu1  ;;  %v701_v13 = vsub.f32 0.0, %v2050_v43 }
  0xed   :  { %1463 = vpow2.f32 %v800_v39  ;;  %v668_v16 = vsub.f32 0.0, %v2053_v45  ;;  %v700_v24 = vsub.f32 0.0, %v2055_v46 }
  0xee   :  { %v1446_v47 = vpop.eup %1445  ;;  %1465 = vpow2.f32 %v734_v40  ;;  %v740_v48 = vmul.f32 1.442695, %v669_v44  ;;  %v804_v37 = vmul.f32 1.442695, %v701_v13 }
  0xef   :  { %v1448_v49 = vpop.eup %1447  ;;  %v855_v50 = vadd.f32 1.0, %v1446_v47  ;;  %1467 = vpow2.f32 %v798_v41  ;;  %v2057_v51 = vpop.f32.mrb[8].mxu0  ;;  %v738_v41 = vmul.f32 1.442695, %v668_v16 }
  0xf0   :  { %v1450_v52 = vpop.eup %1449  ;;  %v887_v53 = vadd.f32 1.0, %v1448_v49  ;;  %1469 = vpow2.f32 %v740_v48  ;;  %v2059_v54 = vpop.f32.mrb[8].mxu1  ;;  %v671_v29 = vsub.f32 0.0, %v2057_v51 }
  0xf1   :  { %v2061_v55 = vpop.f32.mrb[9].mxu0  ;;  %v1452_v56 = vpop.eup %1451  ;;  %1471 = vrcp.f32 %v855_v50  ;;  %v854_v57 = vadd.f32 1.0, %v1450_v52  ;;  %v703_v38 = vsub.f32 0.0, %v2059_v54  ;;  %v802_v50 = vmul.f32 1.442695, %v700_v24 }
  0xf2   :  { %v2063_v58 = vpop.f32.mrb[9].mxu1  ;;  %v1454_v59 = vpop.eup %1453  ;;  %1473 = vrcp.f32 %v887_v53  ;;  %v886_v60 = vadd.f32 1.0, %v1452_v56  ;;  %v670_v44 = vsub.f32 0.0, %v2061_v55 }
  0xf3   :  { %v1456_v61 = vpop.eup %1455  ;;  %1475 = vrcp.f32 %v854_v57  ;;  %v857_v62 = vadd.f32 1.0, %v1454_v59  ;;  %v2065_v63 = vpop.f32.mrb[10].mxu0  ;;  %v702_v52 = vsub.f32 0.0, %v2063_v58 }
  0xf4   :  { %v1458_v0 = vpop.eup %1457  ;;  %1477 = vrcp.f32 %v886_v60  ;;  %v889_v1 = vadd.f32 1.0, %v1456_v61  ;;  %v2067_v2 = vpop.f32.mrb[10].mxu1  ;;  %v744_v60 = vmul.f32 1.442695, %v671_v29  ;;  %v673_v61 = vsub.f32 0.0, %v2065_v63 }
  0xf5   :  { %v2069_v3 = vpop.f32.mrb[11].mxu0  ;;  %v1460_v4 = vpop.eup %1459  ;;  %1479 = vrcp.f32 %v857_v62  ;;  %v856_v5 = vadd.f32 1.0, %v1458_v0  ;;  %v806_v16 = vmul.f32 1.442695, %v702_v52 }
  0xf6   :  { %v2071_v8 = vpop.f32.mrb[11].mxu1  ;;  %v1462_v9 = vpop.eup %1461  ;;  %1481 = vrcp.f32 %v889_v1  ;;  %v888_v12 = vadd.f32 1.0, %v1460_v4  ;;  %v808_v1 = vmul.f32 1.442695, %v703_v38  ;;  %v705_v4 = vsub.f32 0.0, %v2067_v2 }
  0xf7   :  { %v1464_v14 = vpop.eup %1463  ;;  %1483 = vrcp.f32 %v856_v5  ;;  %v859_v15 = vadd.f32 1.0, %v1462_v9  ;;  %v2075_v17 = vpop.f32.mrb[12].mxu0 }
  0xf8   :  { %v1466_v20 = vpop.eup %1465  ;;  %1485 = vrcp.f32 %v888_v12  ;;  %v891_v21 = vadd.f32 1.0, %v1464_v14  ;;  %v2078_v25 = vpop.f32.mrb[12].mxu1  ;;  %v672_v12 = vsub.f32 0.0, %v2069_v3  ;;  %v675_v29 = vsub.f32 0.0, %v2075_v17 }
  0xf9   :  { %v2080_v26 = vpop.f32.mrb[13].mxu0  ;;  %v1468_v27 = vpop.eup %1467  ;;  %1487 = vrcp.f32 %v859_v15  ;;  %v858_v28 = vadd.f32 1.0, %v1466_v20  ;;  %v704_v20 = vsub.f32 0.0, %v2071_v8 }
  0xfa   :  { %v2083_v32 = vpop.f32.mrb[13].mxu1  ;;  %v1470_v33 = vpop.eup %1469  ;;  %1489 = vrcp.f32 %v891_v21  ;;  %v890_v36 = vadd.f32 1.0, %v1468_v27 }
  0xfb   :  { %v1472_v39 = vpop.eup %1471  ;;  %1491 = vrcp.f32 %v858_v28  ;;  %v861_v40 = vadd.f32 1.0, %v1470_v33  ;;  %v2087_v47 = vpop.f32.mrb[14].mxu0  ;;  %v748_v28 = vmul.f32 1.442695, %v673_v61 }
  0xfc   :  { %v1474_v48 = vpop.eup %1473  ;;  %v1047_v49 = vmul.f32 %v1472_v39, %v2012_v6  ;;  %1493 = vrcp.f32 %v890_v36  ;;  %v2091_v53 = vpop.f32.mrb[14].mxu1  ;;  %v812_v36 = vmul.f32 1.442695, %v705_v4 }
  0xfd   :  { %v2093_v56 = vpop.f32.mrb[15].mxu0  ;;  %v1476_v57 = vpop.eup %1475  ;;  %v1079_v59 = vmul.f32 %v1474_v48, %v2014_v7  ;;  %1495 = vrcp.f32 %v861_v40  ;;  %v742_v7 = vmul.f32 1.442695, %v670_v44  ;;  %v746_v40 = vmul.f32 1.442695, %v672_v12 }
  0xfe   :  { %v2097_v62 = vpop.f32.mrb[15].mxu1  ;;  %v1478_v0 = vpop.eup %1477  ;;  %1111 = vst [vmem:[#allocation2 + $0x8] sm:$0xff] %v1047_v49  ;;  %v1046_v6 = vmul.f32 %v1476_v57, %v2018_v10  ;;  %1497 = vpow2.f32 %v804_v37  ;;  %v707_v37 = vsub.f32 0.0, %v2078_v25  ;;  %v752_v57 = vmul.f32 1.442695, %v675_v29 }
  0xff   :  { %v1480_v5 = vpop.eup %1479  ;;  %1143 = vst [vmem:[#allocation2 + $0x108] sm:$0xff] %v1079_v59  ;;  %v1078_v9 = vmul.f32 %v1478_v0, %v2020_v11  ;;  %1499 = vpow2.f32 %v738_v41  ;;  %v2103_v13 = vpop.f32.mrb[16].mxu0 }
 0x100   :  { %v2105_v14 = vpop.f32.mrb[16].mxu1  ;;  %v1482_v15 = vpop.eup %1481  ;;  %1110 = vst [vmem:[#allocation2] sm:$0xff] %v1046_v6  ;;  %v1049_v10 = vmul.f32 %v1480_v5, %v2024_v18  ;;  %1501 = vpow2.f32 %v802_v50  ;;  %v816_v61 = vmul.f32 1.442695, %v707_v37 }
 0x101   :  { %v2109_v21 = vpop.f32.mrb[17].mxu0  ;;  %v2111_v24 = vpop.f32.mrb[17].mxu1  ;;  %1142 = vst [vmem:[#allocation2 + $0x100] sm:$0xff] %v1078_v9  ;;  %v1081_v27 = vmul.f32 %v1482_v15, %v2026_v19  ;;  %1503 = vpow2.f32 %v744_v60 }
 0x102   :  { %v1484_v11 = vpop.eup %1483  ;;  %1113 = vst [vmem:[#allocation2 + $0x18] sm:$0xff] %v1049_v10  ;;  %1505 = vpow2.f32 %v808_v1 }
 0x103   :  { %v1486_v33 = vpop.eup %1485  ;;  %v1048_v18 = vmul.f32 %v1484_v11, %v2030_v22  ;;  %1145 = vst [vmem:[#allocation2 + $0x118] sm:$0xff] %v1081_v27  ;;  %1507 = vpow2.f32 %v742_v7  ;;  %v2118_v41 = vpop.f32.mrb[18].mxu0  ;;  %v810_v22 = vmul.f32 1.442695, %v704_v20 }
 0x104   :  { %v1488_v38 = vpop.eup %1487  ;;  %v1080_v39 = vmul.f32 %v1486_v33, %v2032_v23  ;;  %v2120_v19 = vpop.f32.mrb[18].mxu1  ;;  %1509 = vpow2.f32 %v806_v16 }
 0x105   :  { %v1490_v44 = vpop.eup %1489  ;;  %1112 = vst [vmem:[#allocation2 + $0x10] sm:$0xff] %v1048_v18  ;;  %v1051_v48 = vmul.f32 %v1488_v38, %v2036_v30  ;;  %v2123_v49 = vpop.f32.mrb[19].mxu0  ;;  %1511 = vpow2.f32 %v748_v28 }
 0x106   :  { %v2125_v50 = vpop.f32.mrb[19].mxu1  ;;  %v1492_v52 = vpop.eup %1491  ;;  %1144 = vst [vmem:[#allocation2 + $0x110] sm:$0xff] %v1080_v39  ;;  %v1083_v23 = vmul.f32 %v1490_v44, %v2038_v31  ;;  %1513 = vpow2.f32 %v812_v36 }
 0x107   :  { %v1494_v59 = vpop.eup %1493  ;;  %1115 = vst [vmem:[#allocation2 + $0x28] sm:$0xff] %v1051_v48  ;;  %v1050_v60 = vmul.f32 %v1492_v52, %v2042_v34  ;;  %1515 = vpow2.f32 %v746_v40  ;;  %v2130_v6 = vpop.f32.mrb[20].mxu0  ;;  %v674_v48 = vsub.f32 0.0, %v2080_v26 }
 0x108   :  { %v1496_v0 = vpop.eup %1495  ;;  %1147 = vst [vmem:[#allocation2 + $0x128] sm:$0xff] %v1083_v23  ;;  %v1082_v30 = vmul.f32 %v1494_v59, %v2044_v35  ;;  %v2132_v1 = vpop.f32.mrb[20].mxu1  ;;  %1517 = vpow2.f32 %v810_v22  ;;  %v706_v59 = vsub.f32 0.0, %v2083_v32 }
 0x109   :  { %v1498_v4 = vpop.eup %1497  ;;  %1114 = vst [vmem:[#allocation2 + $0x20] sm:$0xff] %v1050_v60  ;;  %v1053_v31 = vmul.f32 %v1496_v0, %v2048_v42  ;;  %v2135_v5 = vpop.f32.mrb[21].mxu0  ;;  %1519 = vpow2.f32 %v752_v57 }
 0x10a   :  { %v2137_v9 = vpop.f32.mrb[21].mxu1  ;;  %v1500_v34 = vpop.eup %1499  ;;  %1146 = vst [vmem:[#allocation2 + $0x120] sm:$0xff] %v1082_v30  ;;  %v893_v7 = vadd.f32 1.0, %v1498_v4  ;;  %1521 = vpow2.f32 %v816_v61  ;;  %v677_v30 = vsub.f32 0.0, %v2087_v47 }
 0x10b   :  { %v1502_v12 = vpop.eup %1501  ;;  %1117 = vst [vmem:[#allocation2 + $0x38] sm:$0xff] %v1053_v31  ;;  %v860_v35 = vadd.f32 1.0, %v1500_v34  ;;  %v2139_v16 = vpop.f32.mrb[22].mxu0  ;;  %v709_v34 = vsub.f32 0.0, %v2091_v53 }
 0x10c   :  { %v1504_v15 = vpop.eup %1503  ;;  %1523 = vrcp.f32 %v893_v7  ;;  %v892_v10 = vadd.f32 1.0, %v1502_v12  ;;  %v2141_v11 = vpop.f32.mrb[22].mxu1 }
 0x10d   :  { %v1506_v20 = vpop.eup %1505  ;;  %1525 = vrcp.f32 %v860_v35  ;;  %v863_v42 = vadd.f32 1.0, %v1504_v15  ;;  %v2143_v27 = vpop.f32.mrb[23].mxu0  ;;  %v750_v15 = vmul.f32 1.442695, %v674_v48  ;;  %v679_v48 = vsub.f32 0.0, %v2103_v13 }
 0x10e   :  { %v1508_v28 = vpop.eup %1507  ;;  %1527 = vrcp.f32 %v892_v10  ;;  %v895_v29 = vadd.f32 1.0, %v1506_v20  ;;  %v2145_v33 = vpop.f32.mrb[23].mxu1  ;;  %v676_v10 = vsub.f32 0.0, %v2093_v56 }
 0x10f   :  { %v1510_v18 = vpop.eup %1509  ;;  %1529 = vrcp.f32 %v863_v42  ;;  %v862_v36 = vadd.f32 1.0, %v1508_v28  ;;  %v2147_v39 = vpop.f32.mrb[24].mxu0 }
 0x110   :  { %v1512_v37 = vpop.eup %1511  ;;  %1531 = vrcp.f32 %v895_v29  ;;  %v894_v38 = vadd.f32 1.0, %v1510_v18  ;;  %v2150_v22 = vpop.f32.mrb[24].mxu1  ;;  %v814_v18 = vmul.f32 1.442695, %v706_v59 }
 0x111   :  { %v1514_v40 = vpop.eup %1513  ;;  %1533 = vrcp.f32 %v862_v36  ;;  %v865_v44 = vadd.f32 1.0, %v1512_v37  ;;  %v2152_v52 = vpop.f32.mrb[25].mxu0  ;;  %v708_v36 = vsub.f32 0.0, %v2097_v62 }
 0x112   :  { %v1516_v23 = vpop.eup %1515  ;;  %1535 = vrcp.f32 %v894_v38  ;;  %v897_v57 = vadd.f32 1.0, %v1514_v40  ;;  %v2155_v60 = vpop.f32.mrb[25].mxu1 }
 0x113   :  { %v1518_v61 = vpop.eup %1517  ;;  %1537 = vrcp.f32 %v865_v44  ;;  %v864_v0 = vadd.f32 1.0, %v1516_v23  ;;  %v2159_v7 = vpop.f32.mrb[26].mxu0  ;;  %v756_v44 = vmul.f32 1.442695, %v677_v30  ;;  %v678_v30 = vsub.f32 0.0, %v2109_v21 }
 0x114   :  { %v1520_v4 = vpop.eup %1519  ;;  %1539 = vrcp.f32 %v897_v57  ;;  %v896_v31 = vadd.f32 1.0, %v1518_v61  ;;  %v2162_v20 = vpop.f32.mrb[26].mxu1  ;;  %v820_v61 = vmul.f32 1.442695, %v709_v34 }
 0x115   :  { %v1522_v12 = vpop.eup %1521  ;;  %1541 = vrcp.f32 %v864_v0  ;;  %v867_v35 = vadd.f32 1.0, %v1520_v4  ;;  %v2164_v42 = vpop.f32.mrb[27].mxu0  ;;  %v711_v0 = vsub.f32 0.0, %v2105_v14 }
 0x116   :  { %v1524_v28 = vpop.eup %1523  ;;  %1543 = vrcp.f32 %v896_v31  ;;  %v899_v29 = vadd.f32 1.0, %v1522_v12  ;;  %v2167_v37 = vpop.f32.mrb[27].mxu1 }
 0x117   :  { %v1526_v38 = vpop.eup %1525  ;;  %v1085_v40 = vmul.f32 %v1524_v28, %v2050_v43  ;;  %1545 = vrcp.f32 %v867_v35  ;;  %v2173_v4 = vpop.f32.mrb[28].mxu0  ;;  %v754_v43 = vmul.f32 1.442695, %v676_v10  ;;  %v681_v10 = vsub.f32 0.0, %v2118_v41 }
 0x118   :  { %v1528_v23 = vpop.eup %1527  ;;  %v1052_v57 = vmul.f32 %v1526_v38, %v2053_v45  ;;  %1547 = vrcp.f32 %v899_v29  ;;  %v2175_v59 = vpop.f32.mrb[28].mxu1  ;;  %v818_v29 = vmul.f32 1.442695, %v708_v36  ;;  %v710_v38 = vsub.f32 0.0, %v2111_v24 }
 0x119   :  { %2284 = vst [vmem:[#allocation5_spill] sm:$0xff] %v2175_v59  ;;  %v1530_v31 = vpop.eup %1529  ;;  %1149 = vst [vmem:[#allocation2 + $0x138] sm:$0xff] %v1085_v40  ;;  %v1084_v12 = vmul.f32 %v1528_v23, %v2055_v46  ;;  %1549 = vpow2.f32 %v750_v15  ;;  %v2179_v35 = vpop.f32.mrb[29].mxu0  ;;  %v760_v15 = vmul.f32 1.442695, %v679_v48  ;;  %v680_v48 = vsub.f32 0.0, %v2123_v49 }
 0x11a   :  { %v2181_v28 = vpop.f32.mrb[29].mxu1  ;;  %v1532_v45 = vpop.eup %1531  ;;  %1116 = vst [vmem:[#allocation2 + $0x30] sm:$0xff] %v1052_v57  ;;  %v1055_v34 = vmul.f32 %v1530_v31, %v2057_v51  ;;  %1551 = vpow2.f32 %v814_v18  ;;  %v824_v57 = vmul.f32 1.442695, %v711_v0  ;;  %v713_v51 = vsub.f32 0.0, %v2120_v19 }
 0x11b   :  { %v1534_v59 = vpop.eup %1533  ;;  %1148 = vst [vmem:[#allocation2 + $0x130] sm:$0xff] %v1084_v12  ;;  %v1087_v46 = vmul.f32 %v1532_v45, %v2059_v54  ;;  %1553 = vpow2.f32 %v756_v44  ;;  %v2189_v18 = vpop.f32.mrb[30].mxu0  ;;  %v758_v44 = vmul.f32 1.442695, %v678_v30  ;;  %v822_v0 = vmul.f32 1.442695, %v710_v38 }
 0x11c   :  { %v1536_v40 = vpop.eup %1535  ;;  %1119 = vst [vmem:[#allocation2 + $0x48] sm:$0xff] %v1055_v34  ;;  %v1054_v23 = vmul.f32 %v1534_v59, %v2061_v55  ;;  %1555 = vpow2.f32 %v820_v61  ;;  %v2191_v36 = vpop.f32.mrb[30].mxu1 }
 0x11d   :  { %v1538_v31 = vpop.eup %1537  ;;  %1151 = vst [vmem:[#allocation2 + $0x148] sm:$0xff] %v1087_v46  ;;  %v1086_v54 = vmul.f32 %v1536_v40, %v2063_v58  ;;  %1557 = vpow2.f32 %v754_v43  ;;  %v2195_v12 = vpop.f32.mrb[31].mxu0  ;;  %v764_v58 = vmul.f32 1.442695, %v681_v10  ;;  %v828_v46 = vmul.f32 1.442695, %v713_v51 }
 0x11e   :  { %v2197_v45 = vpop.f32.mrb[31].mxu1  ;;  %v1540_v55 = vpop.eup %1539  ;;  %1118 = vst [vmem:[#allocation2 + $0x40] sm:$0xff] %v1054_v23  ;;  %v1057_v61 = vmul.f32 %v1538_v31, %v2065_v63  ;;  %1559 = vpow2.f32 %v818_v29  ;;  %v762_v63 = vmul.f32 1.442695, %v680_v48 }
 0x11f   :  { %v1542_v59 = vpop.eup %1541  ;;  %1150 = vst [vmem:[#allocation2 + $0x140] sm:$0xff] %v1086_v54  ;;  %v1089_v34 = vmul.f32 %v1540_v55, %v2067_v2  ;;  %1561 = vpow2.f32 %v760_v15 }
 0x120   :  { %v1544_v43 = vpop.eup %1543  ;;  %1121 = vst [vmem:[#allocation2 + $0x58] sm:$0xff] %v1057_v61  ;;  %v1056_v30 = vmul.f32 %v1542_v59, %v2069_v3  ;;  %1563 = vpow2.f32 %v824_v57 }
 0x121   :  { %v1546_v40 = vpop.eup %1545  ;;  %1153 = vst [vmem:[#allocation2 + $0x158] sm:$0xff] %v1089_v34  ;;  %v1088_v23 = vmul.f32 %v1544_v43, %v2071_v8  ;;  %1565 = vpow2.f32 %v758_v44 }
 0x122   :  { %v1548_v29 = vpop.eup %1547  ;;  %1120 = vst [vmem:[#allocation2 + $0x50] sm:$0xff] %v1056_v30  ;;  %v1059_v38 = vmul.f32 %v1546_v40, %v2075_v17  ;;  %1567 = vpow2.f32 %v822_v0 }
 0x123   :  { %v1550_v2 = vpop.eup %1549  ;;  %1152 = vst [vmem:[#allocation2 + $0x150] sm:$0xff] %v1088_v23  ;;  %v1091_v15 = vmul.f32 %v1548_v29, %v2078_v25  ;;  %1569 = vpow2.f32 %v764_v58  ;;  %v712_v58 = vsub.f32 0.0, %v2125_v50 }
 0x124   :  { %v1552_v10 = vpop.eup %1551  ;;  %1123 = vst [vmem:[#allocation2 + $0x68] sm:$0xff] %v1059_v38  ;;  %v866_v3 = vadd.f32 1.0, %v1550_v2  ;;  %1571 = vpow2.f32 %v828_v46  ;;  %v683_v46 = vsub.f32 0.0, %v2130_v6  ;;  %v682_v2 = vsub.f32 0.0, %v2135_v5 }
 0x125   :  { %v1554_v57 = vpop.eup %1553  ;;  %1155 = vst [vmem:[#allocation2 + $0x168] sm:$0xff] %v1091_v15  ;;  %v898_v51 = vadd.f32 1.0, %v1552_v10  ;;  %1573 = vpow2.f32 %v762_v63  ;;  %v715_v63 = vsub.f32 0.0, %v2132_v1 }
 0x126   :  { %v1556_v8 = vpop.eup %1555  ;;  %1575 = vrcp.f32 %v866_v3  ;;  %v869_v31 = vadd.f32 1.0, %v1554_v57  ;;  %v826_v3 = vmul.f32 1.442695, %v712_v58  ;;  %v714_v57 = vsub.f32 0.0, %v2137_v9 }
 0x127   :  { %v1558_v54 = vpop.eup %1557  ;;  %1577 = vrcp.f32 %v898_v51  ;;  %v901_v17 = vadd.f32 1.0, %v1556_v8 }
 0x128   :  { %v1560_v44 = vpop.eup %1559  ;;  %1579 = vrcp.f32 %v869_v31  ;;  %v868_v48 = vadd.f32 1.0, %v1558_v54  ;;  %v768_v31 = vmul.f32 1.442695, %v683_v46  ;;  %v685_v54 = vsub.f32 0.0, %v2139_v16 }
 0x129   :  { %v1562_v55 = vpop.eup %1561  ;;  %1581 = vrcp.f32 %v901_v17  ;;  %v900_v25 = vadd.f32 1.0, %v1560_v44 }
 0x12a   :  { %v1564_v61 = vpop.eup %1563  ;;  %1583 = vrcp.f32 %v868_v48  ;;  %v871_v0 = vadd.f32 1.0, %v1562_v55  ;;  %v832_v48 = vmul.f32 1.442695, %v715_v63  ;;  %v717_v55 = vsub.f32 0.0, %v2141_v11 }
 0x12b   :  { %v1566_v59 = vpop.eup %1565  ;;  %1585 = vrcp.f32 %v900_v25  ;;  %v903_v34 = vadd.f32 1.0, %v1564_v61 }
 0x12c   :  { %v1568_v43 = vpop.eup %1567  ;;  %1587 = vrcp.f32 %v871_v0  ;;  %v870_v30 = vadd.f32 1.0, %v1566_v59  ;;  %v766_v0 = vmul.f32 1.442695, %v682_v2  ;;  %v684_v59 = vsub.f32 0.0, %v2143_v27 }
 0x12d   :  { %v1570_v40 = vpop.eup %1569  ;;  %1589 = vrcp.f32 %v903_v34  ;;  %v902_v23 = vadd.f32 1.0, %v1568_v43  ;;  %v830_v43 = vmul.f32 1.442695, %v714_v57 }
 0x12e   :  { %v1572_v29 = vpop.eup %1571  ;;  %1591 = vrcp.f32 %v870_v30  ;;  %v873_v38 = vadd.f32 1.0, %v1570_v40  ;;  %v716_v30 = vsub.f32 0.0, %v2145_v33  ;;  %v772_v40 = vmul.f32 1.442695, %v685_v54 }
 0x12f   :  { %v1574_v15 = vpop.eup %1573  ;;  %1593 = vrcp.f32 %v902_v23  ;;  %v905_v10 = vadd.f32 1.0, %v1572_v29  ;;  %v836_v29 = vmul.f32 1.442695, %v717_v55 }
 0x130   :  { %v1576_v51 = vpop.eup %1575  ;;  %1595 = vrcp.f32 %v873_v38  ;;  %v872_v8 = vadd.f32 1.0, %v1574_v15  ;;  %v770_v15 = vmul.f32 1.442695, %v684_v59  ;;  %v834_v57 = vmul.f32 1.442695, %v716_v30 }
 0x131   :  { %v1578_v17 = vpop.eup %1577  ;;  %v1058_v44 = vmul.f32 %v1576_v51, %v2080_v26  ;;  %1597 = vrcp.f32 %v905_v10 }
 0x132   :  { %v1580_v25 = vpop.eup %1579  ;;  %v1090_v61 = vmul.f32 %v1578_v17, %v2083_v32  ;;  %1599 = vrcp.f32 %v872_v8  ;;  %v687_v32 = vsub.f32 0.0, %v2147_v39 }
 0x133   :  { %v1582_v34 = vpop.eup %1581  ;;  %1122 = vst [vmem:[#allocation2 + $0x60] sm:$0xff] %v1058_v44  ;;  %v1061_v58 = vmul.f32 %v1580_v25, %v2087_v47  ;;  %1601 = vpow2.f32 %v826_v3  ;;  %v719_v47 = vsub.f32 0.0, %v2150_v22 }
 0x134   :  { %v1584_v26 = vpop.eup %1583  ;;  %1154 = vst [vmem:[#allocation2 + $0x160] sm:$0xff] %v1090_v61  ;;  %v1093_v46 = vmul.f32 %v1582_v34, %v2091_v53  ;;  %1603 = vpow2.f32 %v768_v31  ;;  %v686_v53 = vsub.f32 0.0, %v2152_v52  ;;  %v776_v31 = vmul.f32 1.442695, %v687_v32 }
 0x135   :  { %v1586_v23 = vpop.eup %1585  ;;  %1125 = vst [vmem:[#allocation2 + $0x78] sm:$0xff] %v1061_v58  ;;  %v1060_v63 = vmul.f32 %v1584_v26, %v2093_v56  ;;  %1605 = vpow2.f32 %v832_v48  ;;  %v718_v56 = vsub.f32 0.0, %v2155_v60  ;;  %v840_v17 = vmul.f32 1.442695, %v719_v47 }
 0x136   :  { %v1588_v38 = vpop.eup %1587  ;;  %1157 = vst [vmem:[#allocation2 + $0x178] sm:$0xff] %v1093_v46  ;;  %v1092_v2 = vmul.f32 %v1586_v23, %v2097_v62  ;;  %1607 = vpow2.f32 %v766_v0  ;;  %v774_v48 = vmul.f32 1.442695, %v686_v53  ;;  %v721_v53 = vsub.f32 0.0, %v2162_v20 }
 0x137   :  { %v1590_v10 = vpop.eup %1589  ;;  %1124 = vst [vmem:[#allocation2 + $0x70] sm:$0xff] %v1060_v63  ;;  %v1063_v3 = vmul.f32 %v1588_v38, %v2103_v13  ;;  %1609 = vpow2.f32 %v830_v43  ;;  %v689_v38 = vsub.f32 0.0, %v2159_v7 }
 0x138   :  { %v1592_v51 = vpop.eup %1591  ;;  %1156 = vst [vmem:[#allocation2 + $0x170] sm:$0xff] %v1092_v2  ;;  %v1095_v8 = vmul.f32 %v1590_v10, %v2105_v14  ;;  %1611 = vpow2.f32 %v772_v40  ;;  %v838_v14 = vmul.f32 1.442695, %v718_v56 }
 0x139   :  { %v1594_v54 = vpop.eup %1593  ;;  %1127 = vst [vmem:[#allocation2 + $0x88] sm:$0xff] %v1063_v3  ;;  %v1062_v62 = vmul.f32 %v1592_v51, %v2109_v21  ;;  %1613 = vpow2.f32 %v836_v29 }
 0x13a   :  { %v1596_v44 = vpop.eup %1595  ;;  %1159 = vst [vmem:[#allocation2 + $0x188] sm:$0xff] %v1095_v8  ;;  %v1094_v13 = vmul.f32 %v1594_v54, %v2111_v24  ;;  %1615 = vpow2.f32 %v770_v15  ;;  %v720_v8 = vsub.f32 0.0, %v2167_v37 }
 0x13b   :  { %v1598_v55 = vpop.eup %1597  ;;  %1126 = vst [vmem:[#allocation2 + $0x80] sm:$0xff] %v1062_v62  ;;  %v1065_v25 = vmul.f32 %v1596_v44, %v2118_v41  ;;  %1617 = vpow2.f32 %v834_v57  ;;  %v688_v57 = vsub.f32 0.0, %v2164_v42  ;;  %v780_v62 = vmul.f32 1.442695, %v689_v38 }
 0x13c   :  { %v1600_v61 = vpop.eup %1599  ;;  %1158 = vst [vmem:[#allocation2 + $0x180] sm:$0xff] %v1094_v13  ;;  %v1097_v0 = vmul.f32 %v1598_v55, %v2120_v19  ;;  %1619 = vpow2.f32 %v776_v31  ;;  %v2285_v55 = vld [vmem:[#allocation5_spill] sm:$0xff] }
 0x13d   :  { %v1602_v21 = vpop.eup %1601  ;;  %1129 = vst [vmem:[#allocation2 + $0x98] sm:$0xff] %v1065_v25  ;;  %v1064_v59 = vmul.f32 %v1600_v61, %v2123_v49  ;;  %1621 = vpow2.f32 %v840_v17  ;;  %v691_v17 = vsub.f32 0.0, %v2173_v4  ;;  %v723_v25 = vsub.f32 0.0, %v2285_v55 }
 0x13e   :  { %v1604_v34 = vpop.eup %1603  ;;  %1161 = vst [vmem:[#allocation2 + $0x198] sm:$0xff] %v1097_v0  ;;  %v904_v24 = vadd.f32 1.0, %v1602_v21  ;;  %1623 = vpow2.f32 %v774_v48  ;;  %v844_v48 = vmul.f32 1.442695, %v721_v53  ;;  %v778_v0 = vmul.f32 1.442695, %v688_v57 }
 0x13f   :  { %v1606_v58 = vpop.eup %1605  ;;  %1128 = vst [vmem:[#allocation2 + $0x90] sm:$0xff] %v1064_v59  ;;  %v875_v43 = vadd.f32 1.0, %v1604_v34  ;;  %1625 = vpow2.f32 %v838_v14  ;;  %v690_v21 = vsub.f32 0.0, %v2179_v35 }
 0x140   :  { %v1608_v41 = vpop.eup %1607  ;;  %1627 = vrcp.f32 %v904_v24  ;;  %v907_v30 = vadd.f32 1.0, %v1606_v58  ;;  %v842_v24 = vmul.f32 1.442695, %v720_v8  ;;  %v722_v58 = vsub.f32 0.0, %v2181_v28 }
 0x141   :  { %v1610_v26 = vpop.eup %1609  ;;  %1629 = vrcp.f32 %v875_v43  ;;  %v874_v19 = vadd.f32 1.0, %v1608_v41 }
 0x142   :  { %v1612_v46 = vpop.eup %1611  ;;  %1631 = vrcp.f32 %v907_v30  ;;  %v906_v40 = vadd.f32 1.0, %v1610_v26  ;;  %v784_v30 = vmul.f32 1.442695, %v691_v17  ;;  %v693_v26 = vsub.f32 0.0, %v2189_v18 }
 0x143   :  { %v1614_v32 = vpop.eup %1613  ;;  %1633 = vrcp.f32 %v874_v19  ;;  %v877_v49 = vadd.f32 1.0, %v1612_v46  ;;  %v848_v46 = vmul.f32 1.442695, %v723_v25 }
 0x144   :  { %v1616_v23 = vpop.eup %1615  ;;  %1635 = vrcp.f32 %v906_v40  ;;  %v909_v63 = vadd.f32 1.0, %v1614_v32 }
 0x145   :  { %v1618_v29 = vpop.eup %1617  ;;  %1637 = vrcp.f32 %v877_v49  ;;  %v876_v47 = vadd.f32 1.0, %v1616_v23  ;;  %v782_v49 = vmul.f32 1.442695, %v690_v21 }
 0x146   :  { %v1620_v2 = vpop.eup %1619  ;;  %1639 = vrcp.f32 %v909_v63  ;;  %v908_v15 = vadd.f32 1.0, %v1618_v29  ;;  %v846_v29 = vmul.f32 1.442695, %v722_v58 }
 0x147   :  { %v1622_v10 = vpop.eup %1621  ;;  %1641 = vrcp.f32 %v876_v47  ;;  %v879_v3 = vadd.f32 1.0, %v1620_v2  ;;  %v788_v2 = vmul.f32 1.442695, %v693_v26 }
 0x148   :  { %v1624_v56 = vpop.eup %1623  ;;  %1643 = vrcp.f32 %v908_v15  ;;  %v911_v51 = vadd.f32 1.0, %v1622_v10 }
 0x149   :  { %v1626_v31 = vpop.eup %1625  ;;  %1645 = vrcp.f32 %v879_v3  ;;  %v878_v54 = vadd.f32 1.0, %v1624_v56 }
 0x14a   :  { %v1628_v44 = vpop.eup %1627  ;;  %1647 = vrcp.f32 %v911_v51  ;;  %v910_v13 = vadd.f32 1.0, %v1626_v31 }
 0x14b   :  { %v1630_v14 = vpop.eup %1629  ;;  %v1096_v61 = vmul.f32 %v1628_v44, %v2125_v50  ;;  %1649 = vrcp.f32 %v878_v54 }
 0x14c   :  { %v1632_v59 = vpop.eup %1631  ;;  %v1067_v34 = vmul.f32 %v1630_v14, %v2130_v6  ;;  %1651 = vrcp.f32 %v910_v13  ;;  %v725_v6 = vsub.f32 0.0, %v2191_v36 }
 0x14d   :  { %v1634_v43 = vpop.eup %1633  ;;  %1160 = vst [vmem:[#allocation2 + $0x190] sm:$0xff] %v1096_v61  ;;  %v1099_v41 = vmul.f32 %v1632_v59, %v2132_v1  ;;  %1653 = vpow2.f32 %v780_v62  ;;  %v692_v1 = vsub.f32 0.0, %v2195_v12 }
 0x14e   :  { %v1636_v50 = vpop.eup %1635  ;;  %1131 = vst [vmem:[#allocation2 + $0xa8] sm:$0xff] %v1067_v34  ;;  %v1066_v19 = vmul.f32 %v1634_v43, %v2135_v5  ;;  %1655 = vpow2.f32 %v844_v48  ;;  %v724_v5 = vsub.f32 0.0, %v2197_v45  ;;  %v852_v53 = vmul.f32 1.442695, %v725_v6 }
 0x14f   :  { %v1638_v40 = vpop.eup %1637  ;;  %1163 = vst [vmem:[#allocation2 + $0x1a8] sm:$0xff] %v1099_v41  ;;  %v1098_v32 = vmul.f32 %v1636_v50, %v2137_v9  ;;  %1657 = vpow2.f32 %v778_v0  ;;  %v786_v3 = vmul.f32 1.442695, %v692_v1 }
 0x150   :  { %v1640_v23 = vpop.eup %1639  ;;  %1130 = vst [vmem:[#allocation2 + $0xa0] sm:$0xff] %v1066_v19  ;;  %v1069_v63 = vmul.f32 %v1638_v40, %v2139_v16  ;;  %1659 = vpow2.f32 %v842_v24 }
 0x151   :  { %v1642_v47 = vpop.eup %1641  ;;  %1162 = vst [vmem:[#allocation2 + $0x1a0] sm:$0xff] %v1098_v32  ;;  %v1101_v38 = vmul.f32 %v1640_v23, %v2141_v11  ;;  %1661 = vpow2.f32 %v784_v30  ;;  %v850_v11 = vmul.f32 1.442695, %v724_v5 }
 0x152   :  { %v1644_v15 = vpop.eup %1643  ;;  %1133 = vst [vmem:[#allocation2 + $0xb8] sm:$0xff] %v1069_v63  ;;  %v1068_v9 = vmul.f32 %v1642_v47, %v2143_v27  ;;  %1663 = vpow2.f32 %v848_v46 }
 0x153   :  { %v1646_v10 = vpop.eup %1645  ;;  %1165 = vst [vmem:[#allocation2 + $0x1b8] sm:$0xff] %v1101_v38  ;;  %v1100_v16 = vmul.f32 %v1644_v15, %v2145_v33  ;;  %1665 = vpow2.f32 %v782_v49 }
 0x154   :  { %v1648_v57 = vpop.eup %1647  ;;  %1132 = vst [vmem:[#allocation2 + $0xb0] sm:$0xff] %v1068_v9  ;;  %v1071_v56 = vmul.f32 %v1646_v10, %v2147_v39  ;;  %1667 = vpow2.f32 %v846_v29 }
 0x155   :  { %v1650_v51 = vpop.eup %1649  ;;  %1164 = vst [vmem:[#allocation2 + $0x1b0] sm:$0xff] %v1100_v16  ;;  %v1103_v8 = vmul.f32 %v1648_v57, %v2150_v22  ;;  %1669 = vpow2.f32 %v788_v2 }
 0x156   :  { %v1652_v27 = vpop.eup %1651  ;;  %1135 = vst [vmem:[#allocation2 + $0xc8] sm:$0xff] %v1071_v56  ;;  %v1070_v31 = vmul.f32 %v1650_v51, %v2152_v52  ;;  %1671 = vpow2.f32 %v852_v53 }
 0x157   :  { %v1654_v54 = vpop.eup %1653  ;;  %1167 = vst [vmem:[#allocation2 + $0x1c8] sm:$0xff] %v1103_v8  ;;  %v1102_v33 = vmul.f32 %v1652_v27, %v2155_v60  ;;  %1673 = vpow2.f32 %v786_v3 }
 0x158   :  { %v1656_v62 = vpop.eup %1655  ;;  %1134 = vst [vmem:[#allocation2 + $0xc0] sm:$0xff] %v1070_v31  ;;  %v881_v39 = vadd.f32 1.0, %v1654_v54  ;;  %1675 = vpow2.f32 %v850_v11 }
 0x159   :  { %v1658_v17 = vpop.eup %1657  ;;  %1166 = vst [vmem:[#allocation2 + $0x1c0] sm:$0xff] %v1102_v33  ;;  %v913_v44 = vadd.f32 1.0, %v1656_v62 }
 0x15a   :  { %v1660_v13 = vpop.eup %1659  ;;  %1677 = vrcp.f32 %v881_v39  ;;  %v880_v22 = vadd.f32 1.0, %v1658_v17 }
 0x15b   :  { %v1662_v48 = vpop.eup %1661  ;;  %1679 = vrcp.f32 %v913_v44  ;;  %v912_v25 = vadd.f32 1.0, %v1660_v13 }
 0x15c   :  { %v1664_v52 = vpop.eup %1663  ;;  %1681 = vrcp.f32 %v880_v22  ;;  %v883_v14 = vadd.f32 1.0, %v1662_v48 }
 0x15d   :  { %v1666_v61 = vpop.eup %1665  ;;  %1683 = vrcp.f32 %v912_v25  ;;  %v915_v60 = vadd.f32 1.0, %v1664_v52 }
 0x15e   :  { %v1668_v0 = vpop.eup %1667  ;;  %1685 = vrcp.f32 %v883_v14  ;;  %v882_v21 = vadd.f32 1.0, %v1666_v61 }
 0x15f   :  { %v1670_v59 = vpop.eup %1669  ;;  %1687 = vrcp.f32 %v915_v60  ;;  %v914_v34 = vadd.f32 1.0, %v1668_v0 }
 0x160   :  { %v1672_v24 = vpop.eup %1671  ;;  %1689 = vrcp.f32 %v882_v21  ;;  %v885_v58 = vadd.f32 1.0, %v1670_v59 }
 0x161   :  { %v1674_v43 = vpop.eup %1673  ;;  %1691 = vrcp.f32 %v914_v34  ;;  %v917_v41 = vadd.f32 1.0, %v1672_v24 }
 0x162   :  { %v1676_v30 = vpop.eup %1675  ;;  %1693 = vrcp.f32 %v885_v58  ;;  %v884_v26 = vadd.f32 1.0, %v1674_v43 }
 0x163   :  { %1695 = vrcp.f32 %v917_v41  ;;  %v916_v50 = vadd.f32 1.0, %v1676_v30 }
 0x164   :  { %v1678_v19 = vpop.eup %1677  ;;  %1697 = vrcp.f32 %v884_v26 }
 0x165   :  { %v1680_v46 = vpop.eup %1679  ;;  %v1073_v6 = vmul.f32 %v1678_v19, %v2159_v7  ;;  %1699 = vrcp.f32 %v916_v50 }
 0x166   :  { %v1682_v40 = vpop.eup %1681  ;;  %v1105_v32 = vmul.f32 %v1680_v46, %v2162_v20 }
 0x167   :  { %v1684_v49 = vpop.eup %1683  ;;  %1137 = vst [vmem:[#allocation2 + $0xd8] sm:$0xff] %v1073_v6  ;;  %v1072_v1 = vmul.f32 %v1682_v40, %v2164_v42 }
 0x168   :  { %v1686_v23 = vpop.eup %1685  ;;  %1169 = vst [vmem:[#allocation2 + $0x1d8] sm:$0xff] %v1105_v32  ;;  %v1104_v63 = vmul.f32 %v1684_v49, %v2167_v37 }
 0x169   :  { %v1688_v29 = vpop.eup %1687  ;;  %1136 = vst [vmem:[#allocation2 + $0xd0] sm:$0xff] %v1072_v1  ;;  %v1075_v5 = vmul.f32 %v1686_v23, %v2173_v4 }
 0x16a   :  { %v1690_v47 = vpop.eup %1689  ;;  %1168 = vst [vmem:[#allocation2 + $0x1d0] sm:$0xff] %v1104_v63  ;;  %v1107_v7 = vmul.f32 %v1688_v29, %v2285_v55 }
 0x16b   :  { %v1692_v38 = vpop.eup %1691  ;;  %1139 = vst [vmem:[#allocation2 + $0xe8] sm:$0xff] %v1075_v5  ;;  %v1074_v20 = vmul.f32 %v1690_v47, %v2179_v35 }
 0x16c   :  { %v1694_v2 = vpop.eup %1693  ;;  %1171 = vst [vmem:[#allocation2 + $0x1e8] sm:$0xff] %v1107_v7  ;;  %v1106_v42 = vmul.f32 %v1692_v38, %v2181_v28 }
 0x16d   :  { %v1696_v15 = vpop.eup %1695  ;;  %1138 = vst [vmem:[#allocation2 + $0xe0] sm:$0xff] %v1074_v20  ;;  %v1077_v37 = vmul.f32 %v1694_v2, %v2189_v18 }
 0x16e   :  { %v1698_v9 = vpop.eup %1697  ;;  %1170 = vst [vmem:[#allocation2 + $0x1e0] sm:$0xff] %v1106_v42  ;;  %v1109_v4 = vmul.f32 %v1696_v15, %v2191_v36 }
 0x16f   :  { %v1700_v53 = vpop.eup %1699  ;;  %1141 = vst [vmem:[#allocation2 + $0xf8] sm:$0xff] %v1077_v37  ;;  %v1076_v55 = vmul.f32 %v1698_v9, %v2195_v12 }
 0x170   :  { %1173 = vst [vmem:[#allocation2 + $0x1f8] sm:$0xff] %v1109_v4  ;;  %v1108_v35 = vmul.f32 %v1700_v53, %v2197_v45 }
 0x171   :  { %1140 = vst [vmem:[#allocation2 + $0xf0] sm:$0xff] %v1076_v55 }
 0x172   :  { %1172 = vst [vmem:[#allocation2 + $0x1f0] sm:$0xff] %v1108_v35 }
 0x173   :  { %1712 = shalt.err (!%p1709_p4)
}
 0x174   :  { %s1713_s4 = scalar_lea.hbm %s2282_s2, 8192 }
 0x175   :  { %p1714_p5 = scmp.ne.s32.totalorder %s2282_s2, %s1713_s4  ;;  %p1717_p6 = scmp.lt.u32.totalorder %s1713_s4, %s2282_s2 }
 0x177   :  { %p1719_p7 = pnand %p1717_p6, %p1714_p5 }
 0x179   :  { %1722 = shalt.err (!%p1719_p7)
}
 0x17a   :  { %s1727_s9 = smov 128   ;;  %s1728_s10 = smov 8  }
 0x17b   :  { %1185 = dma.vmem_to_hbm [thread:$0]  %s1180_s28, 8192, %s2282_s2, [#allocation3], %s1727_s9, %s1727_s9, %s1728_s10  }
 0x17c   :  { %1723 = dma.done.wait [#allocation3], 8192  }
 0x17d   :  { %1724 = vsyncadd [#allocation3], 4294959104 }
 0x17e   :  { %1189 = vsyncpa [#allocation3], 1 }

</bundles_post_ra>
